<compile_context>
chip_gen: v6e
topology: v6e:2x2x1
jax: 0.10.0
libtpu: 0.0.40
codegen_flags: <defaults>
</compile_context>

<pallas_src>
import functools

import jax
import jax.numpy as jnp
from jax.experimental import pallas as pl
from jax.experimental.pallas import tpu as pltpu


def dqn_mlp_kernel(x_ref, w1_ref, b1_ref, w2_ref, b2_ref, o_ref):
    # hidden = relu(x @ W1 + b1)   (bf16 MXU inputs, f32 accumulate + VPU math)
    h = jnp.dot(x_ref[...], w1_ref[...], preferred_element_type=jnp.float32)
    h = jnp.maximum(h + b1_ref[...], 0.0)
    # q = hidden @ W2 + b2         (feed bf16 back into the MXU, f32 accumulate)
    q = jnp.dot(h.astype(w2_ref.dtype), w2_ref[...],
                preferred_element_type=jnp.float32)
    o_ref[...] = (q + b2_ref[...]).astype(o_ref.dtype)


def dqn_forward_pallas(x, w1, b1, w2, b2, *, tile_b=512):
    """Batched Q-value evaluation. x: (B, S) f32; returns (B, action_dim) f32."""
    batch, state_dim = x.shape
    hidden = w1.shape[1]
    action_dim = w2.shape[1]

    # Lane-dense output width (multiple of 128).
    out_pad = max(128, pl.cdiv(action_dim, 128) * 128)

    # Batch tile: multiple of 8 sublanes, no larger than the padded batch.
    tile_b = min(max(tile_b, 8), ((batch + 7) // 8) * 8)
    tile_b = max(8, (tile_b // 8) * 8)
    b_pad = pl.cdiv(batch, tile_b) * tile_b
    n_tiles = b_pad // tile_b

    # Pad batch rows with zeros; cast MXU operands to bf16, keep biases f32.
    x_bf = x.astype(jnp.bfloat16)
    if b_pad == batch:
        x_p = x_bf
    else:
        x_p = jnp.zeros((b_pad, state_dim), jnp.bfloat16).at[:batch].set(x_bf)
    w1_b = w1.astype(jnp.bfloat16)
    b1_f = b1.reshape(1, hidden).astype(jnp.float32)
    w2_p = jnp.zeros((hidden, out_pad), jnp.bfloat16).at[:, :action_dim].set(
        w2.astype(jnp.bfloat16))
    b2_p = jnp.zeros((1, out_pad), jnp.float32).at[:, :action_dim].set(
        b2.reshape(1, action_dim).astype(jnp.float32))

    flops = 2 * b_pad * (state_dim * hidden + hidden * out_pad)
    bytes_accessed = (x_p.size * 2 + w1_b.size * 2 + w2_p.size * 2
                      + b1_f.size * 4 + b2_p.size * 4 + b_pad * out_pad * 4)

    q_padded = pl.pallas_call(
        dqn_mlp_kernel,
        out_shape=jax.ShapeDtypeStruct((b_pad, out_pad), jnp.float32),
        grid=(n_tiles,),
        in_specs=[
            pl.BlockSpec((tile_b, state_dim), lambda i: (i, 0)),   # x tile
            pl.BlockSpec((state_dim, hidden), lambda i: (0, 0)),   # W1 resident
            pl.BlockSpec((1, hidden), lambda i: (0, 0)),           # b1 resident
            pl.BlockSpec((hidden, out_pad), lambda i: (0, 0)),     # W2 resident
            pl.BlockSpec((1, out_pad), lambda i: (0, 0)),          # b2 resident
        ],
        out_specs=pl.BlockSpec((tile_b, out_pad), lambda i: (i, 0)),
        compiler_params=pltpu.CompilerParams(
            dimension_semantics=("parallel",)),
        cost_estimate=pl.CostEstimate(
            flops=flops, transcendentals=0, bytes_accessed=bytes_accessed),
    )(x_p, w1_b, b1_f, w2_p, b2_p)

    return q_padded[:batch, :action_dim]


def dqn_forward_reference(x, w1, b1, w2, b2):
    """Plain-XLA path (also used for tiny acting-time batches)."""
    return jnp.maximum(x @ w1 + b1.reshape(1, -1), 0.0) @ w2 + b2.reshape(1, -1)


def dqn_forward(x, w1, b1, w2, b2, *, tile_b=512):
    # Tiny per-step acting batches: XLA's fused GEMM beats a Pallas launch.
    if x.shape[0] <= 32:
        return dqn_forward_reference(x, w1, b1, w2, b2)
    return dqn_forward_pallas(x, w1, b1, w2, b2, tile_b=tile_b)


def init_params(key, state_dim, hidden_dim, action_dim):
    # Deterministic init mimicking nn.Linear's uniform(-1/sqrt(fan_in), 1/sqrt(fan_in)).
    k1, k2, k3, k4 = jax.random.split(key, 4)
    bound1 = 1.0 / jnp.sqrt(state_dim)
    bound2 = 1.0 / jnp.sqrt(hidden_dim)
    w1 = jax.random.uniform(k1, (state_dim, hidden_dim), jnp.float32, -bound1, bound1)
    b1 = jax.random.uniform(k2, (hidden_dim,), jnp.float32, -bound1, bound1)
    w2 = jax.random.uniform(k3, (hidden_dim, action_dim), jnp.float32, -bound2, bound2)
    b2 = jax.random.uniform(k4, (action_dim,), jnp.float32, -bound2, bound2)
    return w1, b1, w2, b2


if __name__ == "__main__":
    state_dim, hidden_dim, action_dim = 16, 128, 4
    batch = 64          # training-style minibatch; tile_b=32 -> 2 grid steps

    key = jax.random.PRNGKey(0)
    kx, kp = jax.random.split(key)
    x = jax.random.normal(kx, (batch, state_dim), jnp.float32)
    w1, b1, w2, b2 = init_params(kp, state_dim, hidden_dim, action_dim)

    fwd = functools.partial(dqn_forward_pallas, tile_b=32)
    q = jax.block_until_ready(fwd(x, w1, b1, w2, b2))
    assert q.shape == (batch, action_dim)

    # Reference in plain JAX with the same bf16 rounding of MXU inputs.
    xb = x.astype(jnp.bfloat16).astype(jnp.float32)
    w1b = w1.astype(jnp.bfloat16).astype(jnp.float32)
    w2b = w2.astype(jnp.bfloat16).astype(jnp.float32)
    h = jnp.maximum(xb @ w1b + b1.reshape(1, -1), 0.0)
    ref = h.astype(jnp.bfloat16).astype(jnp.float32) @ w2b + b2.reshape(1, -1)
    assert jnp.allclose(q, ref, atol=1e-2, rtol=1e-2), float(jnp.abs(q - ref).max())

    # Sanity-check vs. full-f32 math (bf16 quantization error only).
    ref_f32 = dqn_forward_reference(x, w1, b1, w2, b2)
    assert jnp.allclose(q, ref_f32, atol=5e-2, rtol=5e-2)

    print("KERNEL_OK")
</pallas_src>

<mosaic_0001>
module attributes {stable_mosaic.version = 11 : i64} {
  func.func @dqn_mlp_kernel(%arg0: i32, %arg1: memref<32x16xbf16, #tpu.memory_space<vmem>>, %arg2: memref<16x128xbf16, #tpu.memory_space<vmem>>, %arg3: memref<1x128xf32, #tpu.memory_space<vmem>>, %arg4: memref<128x128xbf16, #tpu.memory_space<vmem>>, %arg5: memref<1x128xf32, #tpu.memory_space<vmem>>, %arg6: memref<32x128xf32, #tpu.memory_space<vmem>>) attributes {dimension_semantics = [#tpu.dimension_semantics<parallel>], iteration_bounds = array<i64: 2>, scalar_prefetch = 0 : i64, scratch_operands = 0 : i64, tpu.core_type = #tpu.core_type<tc>, window_params = [{transform_indices = @transform_0, window_bounds = array<i64: 32, 16>}, {pipeline_mode = #tpu.pipeline_mode<synchronous>, transform_indices = @transform_1, window_bounds = array<i64: 16, 128>}, {pipeline_mode = #tpu.pipeline_mode<synchronous>, transform_indices = @transform_2, window_bounds = array<i64: 1, 128>}, {pipeline_mode = #tpu.pipeline_mode<synchronous>, transform_indices = @transform_3, window_bounds = array<i64: 128, 128>}, {pipeline_mode = #tpu.pipeline_mode<synchronous>, transform_indices = @transform_4, window_bounds = array<i64: 1, 128>}, {transform_indices = @transform_5, window_bounds = array<i64: 32, 128>}]} {
    %c0 = arith.constant 0 : index
    %c0_0 = arith.constant 0 : index
    %0 = vector.load %arg1[%c0, %c0_0] : memref<32x16xbf16, #tpu.memory_space<vmem>>, vector<32x16xbf16>
    %c0_1 = arith.constant 0 : index
    %c0_2 = arith.constant 0 : index
    %1 = vector.load %arg2[%c0_1, %c0_2] : memref<16x128xbf16, #tpu.memory_space<vmem>>, vector<16x128xbf16>
    %cst = arith.constant dense<0.000000e+00> : vector<32x128xf32>
    %2 = tpu.matmul %0, %1, %cst {dimension_numbers = #tpu.dot_dimension_numbers<[1], [0], [0], [1], [0, 0, 1, 1], [], []>} : vector<32x16xbf16>, vector<16x128xbf16>, vector<32x128xf32> -> vector<32x128xf32>
    %c0_3 = arith.constant 0 : index
    %c0_4 = arith.constant 0 : index
    %3 = vector.load %arg3[%c0_3, %c0_4] : memref<1x128xf32, #tpu.memory_space<vmem>>, vector<1x128xf32>
    %4 = vector.broadcast %3 : vector<1x128xf32> to vector<32x128xf32>
    %5 = arith.addf %2, %4 : vector<32x128xf32>
    %cst_5 = arith.constant 0.000000e+00 : f32
    %6 = vector.broadcast %cst_5 : f32 to vector<32x128xf32>
    %7 = arith.maximumf %5, %6 : vector<32x128xf32>
    %8 = arith.truncf %7 : vector<32x128xf32> to vector<32x128xbf16>
    %c0_6 = arith.constant 0 : index
    %c0_7 = arith.constant 0 : index
    %9 = vector.load %arg4[%c0_6, %c0_7] : memref<128x128xbf16, #tpu.memory_space<vmem>>, vector<128x128xbf16>
    %cst_8 = arith.constant dense<0.000000e+00> : vector<32x128xf32>
    %10 = tpu.matmul %8, %9, %cst_8 {dimension_numbers = #tpu.dot_dimension_numbers<[1], [0], [0], [1], [0, 0, 1, 1], [], []>} : vector<32x128xbf16>, vector<128x128xbf16>, vector<32x128xf32> -> vector<32x128xf32>
    %c0_9 = arith.constant 0 : index
    %c0_10 = arith.constant 0 : index
    %11 = vector.load %arg5[%c0_9, %c0_10] : memref<1x128xf32, #tpu.memory_space<vmem>>, vector<1x128xf32>
    %12 = vector.broadcast %11 : vector<1x128xf32> to vector<32x128xf32>
    %13 = arith.addf %10, %12 : vector<32x128xf32>
    %c0_11 = arith.constant 0 : index
    %c0_12 = arith.constant 0 : index
    %14 = vector.load %arg6[%c0_11, %c0_12] : memref<32x128xf32, #tpu.memory_space<vmem>>, vector<32x128xf32>
    tpu.vector_store %arg6[%c0_11, %c0_12], %13 {strides = array<i32>} : memref<32x128xf32, #tpu.memory_space<vmem>>, vector<32x128xf32>,
    return
  }
  func.func @transform_0(%arg0: i32) -> (i32, i32) {
    %c0_i32 = arith.constant 0 : i32
    %c0_i32_0 = arith.constant 0 : i32
    return %arg0, %c0_i32 : i32, i32
  }
  func.func @transform_1(%arg0: i32) -> (i32, i32) {
    %c0_i32 = arith.constant 0 : i32
    %c0_i32_0 = arith.constant 0 : i32
    %c0_i32_1 = arith.constant 0 : i32
    return %c0_i32, %c0_i32_0 : i32, i32
  }
  func.func @transform_2(%arg0: i32) -> (i32, i32) {
    %c0_i32 = arith.constant 0 : i32
    %c0_i32_0 = arith.constant 0 : i32
    %c0_i32_1 = arith.constant 0 : i32
    return %c0_i32, %c0_i32_0 : i32, i32
  }
  func.func @transform_3(%arg0: i32) -> (i32, i32) {
    %c0_i32 = arith.constant 0 : i32
    %c0_i32_0 = arith.constant 0 : i32
    %c0_i32_1 = arith.constant 0 : i32
    return %c0_i32, %c0_i32_0 : i32, i32
  }
  func.func @transform_4(%arg0: i32) -> (i32, i32) {
    %c0_i32 = arith.constant 0 : i32
    %c0_i32_0 = arith.constant 0 : i32
    %c0_i32_1 = arith.constant 0 : i32
    return %c0_i32, %c0_i32_0 : i32, i32
  }
  func.func @transform_5(%arg0: i32) -> (i32, i32) {
    %c0_i32 = arith.constant 0 : i32
    %c0_i32_0 = arith.constant 0 : i32
    return %arg0, %c0_i32 : i32, i32
  }
}

</mosaic_0001>

<bundles_post_ra>
// kernel: tpu_custom_call.1
= control target key start
LH: loop header
LB: loop body
LE: loop exit
PB: predicated region body
PF: predicated region fallthrough
CT: control target
= control target key end

     0   :  { %10 = vsyncpa [#allocation3], 0  ;;  %s935_s0 = inlined_call_operand.vmem [shape: bf16[64,16], index: 0, kind: input, shape index: {}]   ;;  %s936_s1 = inlined_call_operand.vmem [shape: bf16[16,128], index: 1, kind: input, shape index: {}]   ;;  %s937_s2 = inlined_call_operand.vmem [shape: f32[1,128], index: 2, kind: input, shape index: {}]   ;;  %s938_s3 = inlined_call_operand.hbm [shape: bf16[128,128], index: 3, kind: input, shape index: {}]   ;;  %s939_s4 = inlined_call_operand.vmem [shape: f32[1,128], index: 4, kind: input, shape index: {}]   ;;  %s940_s5 = inlined_call_operand.hbm [shape: f32[64,128], index: 5, kind: output, shape index: {}]  }
   0x1   :  { %11 = vsyncpa [#allocation4], 0 }
   0x2   :  { %13 = vsyncpa [#allocation4 + $0x1], 0  ;;  %s807_s18 = smov 0   ;;  %s809_s19 = smov 0  }
   0x3   :  { %s811_s20 = smov 0   ;;  %s813_s21 = smov 0  }
   0x4 LB: > { %s828_s22 = sadd.s32 4294967295, %s769_s21   ;;  %s545_s23 = sadd.s32 4294967294, %s769_s21   ;;  %s769_s21 = sphi %s813_s21, %s948_s21   ;;  %s765_s20 = sphi %s811_s20, %s947_s20   ;;  %s761_s19 = sphi %s809_s19, %s946_s19   ;;  %s757_s18 = sphi %s807_s18, %s945_s18  }
   0x5   : > { %s832_s24 = sadd.s32 1, %s769_s21   ;;  %s136_s25 = sadd.s32 1, %s765_s20 }
   0x6   : > { %s133_s26 = ssub.s32 %s769_s21, %s832_s24  ;;  %p146_p0 = scmp.ne.s32.totalorder %s765_s20, %s761_s19 }
   0x7   : > { %p134_p1 = scmp.eq.s32.totalorder %s133_s26, 0  ;;  %p147_p2 = scmp.eq.s32.totalorder %s828_s22, 1 }
   0x8   : > { %p152_p3 = scmp.ne.s32.totalorder %s761_s19, %s757_s18  ;;  %p153_p4 = scmp.eq.s32.totalorder %s545_s23, 1 }
   0x9   : > { %s843_s27 = scalar_select %p134_p1, %s765_s20, %s136_s25  }
   0xa   : > { %p845_p5 = por %p147_p2, %p146_p0  ;;  %p849_p6 = por %p153_p4, %p152_p3 }
   0xb   : > { %p546_p7 = scmp.ge.s32.totalorder %s769_s21, 1  ;;  %p160_p8 = scmp.lt.s32.totalorder %s769_s21, 3 }
   0xc   : > { %s942_s29 = scalar_select %p849_p6, 1, 0 }
   0xd   : > { %p628_p9 = scmp.eq.s32.totalorder %s828_s22, 0  ;;  %p856_p10 = pnand %p546_p7, %p160_p8 }
   0xe   : > { %s771_s6 = smov [#allocation2]  }
   0xf   : > { %s178_s7 = sshll.u32 %s771_s6, 4  ;;  %p620_p11 = pneg %p856_p10  ;;  %s179_s7 = int_to_ptr.vmem [resolvable:$true] %s178_s7 }
  0x10   : > { %s690_s8 = scalar_lea.vmem %s179_s7, 1024  ;;  %p698_p3 = scmp.lt.s32.totalorder %s179_s7, %s179_s7 }
  0x11   : > { %p621_p12 = pnand %p628_p9, %p620_p11  ;;  %p691_p0 = scmp.ne.s32.totalorder %s179_s7, %s690_s8 }
  0x12   : > { %p699_p4 = scmp.lt.s32.totalorder %s690_s8, %s690_s8 }
  0x13   : > { %p681_p13 = pneg %p621_p12 }
  0x14   : > { %p700_p6 = por %p699_p4, %p698_p3 }
  0x15   : > { %p693_p1 = pnand %p691_p0, %p681_p13 }
  0x17   : > { %p694_p2 = pneg %p693_p1 }
  0x19   : > { %p701_p7 = pnand %p700_p6, %p694_p2 }
  0x1b   : > { %704 = shalt.err (!%p701_p7)
}
  0x1c   : > { %s772_s9 = smov 64   ;;  %s773_s10 = smov 4  }
  0x1d   : > { %623 = dma.hbm_to_vmem [thread:$0]  (!%p621_p12), %s938_s3, 1024, %s179_s7, [#allocation3], %s772_s9, %s772_s9, %s773_s10  }
  0x1e   : > { %206 = sbr.rel (%p856_p10) target bundleno = 465 (0x1d1), region = 40 }
  0x23   : > { %748 = dma.done.wait (%p628_p9), [#allocation3], 1024  }
  0x24   : > { %750 = vsyncadd (%p628_p9), [#allocation3], 4294966272  ;;  %s552_s13 = sshll.u32 %s828_s22, 2  ;;  %v668_v0 = vld [vmem:[%s936_s1] sm:$0xff]   ;;  %vm271_vm0 = vcmask 130048   ;;  %v671_v3 = vld [vmem:[#allocation2 + $0x38] sm:$0xff]  }
  0x25   : > { %p235_p8 = scmp.lt.s32.totalorder %s552_s13, 7  ;;  %588 = vmatprep.subr.bf16.mxu0 %v668_v0  ;;  %v672_v4 = vld [vmem:[#allocation2 + $0x30] sm:$0xff]   ;;  %594 = vmatprep.subr.bf16.mxu1 %v671_v3  ;;  %v673_v5 = vld [vmem:[#allocation2 + $0x28] sm:$0xff]   ;;  %v674_v6 = vld [vmem:[#allocation2 + $0x20] sm:$0xff]   ;;  %s231_s6 = sand.u32 1, %s761_s19  }
  0x26   : > { %589 = vmatpush3.bf16.msra.mxu0 %v668_v0  ;;  %595 = vmatpush3.bf16.msra.mxu1 %v671_v3  ;;  %v675_v7 = vld [vmem:[#allocation2 + $0x18] sm:$0xff]   ;;  %v676_v8 = vld [vmem:[#allocation2 + $0x10] sm:$0xff]   ;;  %v677_v9 = vld [vmem:[#allocation2 + $0x8] sm:$0xff]   ;;  %s551_s7 = sshll.u32 %s231_s6, 5  ;;  %s574_s12 = sshll.u32 %s828_s22, 9 }
  0x27   : > { %s950_s13 = smov (!%p235_p8, %s552_s13), 7  ;;  %596 = vmatprep.subr.bf16.mxu1 %v672_v4  ;;  %v678_v10 = vld [vmem:[#allocation2] sm:$0xff]   ;;  %s233_s10 = scalar_lea.vmem [#allocation5], %s551_s7 }
  0x28   : > { %s553_s14 = sshll.u32 %s950_s13, 2  ;;  %v554_v13 = vld [vmem:[%s937_s2] ss:$0 sm:$0xff]  ;;  %s471_s11 = sshll.u32 %s233_s10, 4  ;;  %s888_s11 = int_to_ptr.vmem [resolvable:$true] %s471_s11 }
  0x29   : > { %s238_s17 = scalar_lea.vmem %s935_s0, %s553_s14  ;;  %v560_v26 = vld [vmem:[%s939_s4] ss:$0 sm:$0xff]  ;;  %s893_s15 = scalar_lea.hbm %s940_s5, %s574_s12 }
  0x2a   : > { %v669_v1 = vld [vmem:[%s238_s17] sm:$0xff]   ;;  %v670_v2 = vld [vmem:[%s238_s17 + $0x8] sm:$0xff]   ;;  %597 = vmatpush3.bf16.msra.mxu1 %v672_v4  ;;  %s895_s16 = scalar_lea.sflag [#allocation4], %s231_s6  ;;  %s705_s22 = scalar_lea.vmem %s888_s11, 512 }
  0x2b   : > { %590 = vmatprep.mubr.msk.bf16.mxu0 %vm271_vm0, %v669_v1  ;;  %598 = vmatprep.subr.bf16.mxu1 %v673_v5  ;;  %p706_p6 = scmp.ne.s32.totalorder %s888_s11, %s705_s22  ;;  %s774_s17 = smov [#allocation5]  }
  0x2c   : > { %591 = vmatmul.mubr.msk.bf16.vlgmr.msra.gmra.mxu0 %vm271_vm0, %v670_v2  ;;  %s709_s23 = sshll.u32 %s774_s17, 4  ;;  %s710_s23 = int_to_ptr.vmem [resolvable:$false] %s709_s23 }
  0x2d   : > { %p707_p9 = pnand %p706_p6, %p845_p5  ;;  %s711_s25 = scalar_lea.vmem %s710_s23, 1024 }
  0x2e   : > { %599 = vmatpush3.bf16.msra.mxu1 %v673_v5  ;;  %p712_p11 = scmp.lt.s32.totalorder %s888_s11, %s710_s23  ;;  %p713_p12 = scmp.lt.s32.totalorder %s711_s25, %s705_s22 }
  0x2f   : > { %600 = vmatprep.subr.bf16.mxu1 %v674_v6  ;;  %p708_p10 = pneg %p707_p9 }
  0x30   : > { %p714_p13 = por %p713_p12, %p712_p11 }
  0x32   : > { %601 = vmatpush3.bf16.msra.mxu1 %v674_v6  ;;  %p715_p0 = pnand %p714_p13, %p708_p10 }
  0x33   : > { %602 = vmatprep.subr.bf16.mxu1 %v675_v7 }
  0x36   : > { %603 = vmatpush3.bf16.msra.mxu1 %v675_v7 }
  0x37   : > { %604 = vmatprep.subr.bf16.mxu1 %v676_v8 }
  0x3a   : > { %605 = vmatpush3.bf16.msra.mxu1 %v676_v8 }
  0x3b   : > { %606 = vmatprep.subr.bf16.mxu1 %v677_v9 }
  0x3e   : > { %607 = vmatpush3.bf16.msra.mxu1 %v677_v9 }
  0x3f   : > { %608 = vmatprep.subr.bf16.mxu1 %v678_v10 }
  0x42   : > { %609 = vmatpush3.bf16.msra.mxu1 %v678_v10 }
  0xec   : > { %v592_v11 = vpop.f32.mrf.mxu0 }
  0xed   : > { %v321_v17 = vadd.f32 %v592_v11, %v554_v13 }
  0xee   : > { %v312_v12 = vpop.f32.mrf.mxu0 }
  0xef   : > { %v313_v15 = vadd.f32 %v554_v13, %v312_v12  ;;  %v329_v23 = vmax.f32 %v321_v17, 0.0 }
  0xf0   : > { %v593_v14 = vpop.f32.mrf.mxu0 }
  0xf1   : > { %v324_v16 = vadd.f32 %v593_v14, %v554_v13  ;;  %v327_v21 = vmax.f32 %v313_v15, 0.0 }
  0xf2   : > { %v315_v18 = vpop.f32.mrf.mxu0 }
  0xf3   : > { %v316_v19 = vadd.f32 %v554_v13, %v315_v18  ;;  %v330_v20 = vmax.f32 %v324_v16, 0.0 }
  0xf5   : > { %v328_v22 = vmax.f32 %v316_v19, 0.0  ;;  %v332_v25 = vpack.c.bf16 %v330_v20, %v329_v23 }
  0xf7   : > { %v331_v24 = vpack.c.bf16 %v328_v22, %v327_v21 }
  0xf9   : > { %610 = vmatprep.mubr.bf16.mxu1 %v331_v24 }
  0xfa   : > { %611 = vmatmul.mubr.bf16.vlgmr.msra.gmra.mxu1 %v332_v25 }
 0x1ba   : > { %v612_v27 = vpop.f32.mrf.mxu1 }
 0x1bb   : > { %v447_v28 = vadd.f32 %v612_v27, %v560_v26 }
 0x1bc   : > { %v438_v29 = vpop.f32.mrf.mxu1 }
 0x1bd   : > { %455 = vst [vmem:[%s233_s10 + $0x10] sm:$0xff] %v447_v28  ;;  %v439_v30 = vadd.f32 %v560_v26, %v438_v29 }
 0x1be   : > { %v613_v31 = vpop.f32.mrf.mxu1 }
 0x1bf   : > { %453 = vst [vmem:[%s233_s10] sm:$0xff] %v439_v30  ;;  %v450_v32 = vadd.f32 %v613_v31, %v560_v26 }
 0x1c0   : > { %v441_v33 = vpop.f32.mrf.mxu1 }
 0x1c1   : > { %456 = vst [vmem:[%s233_s10 + $0x18] sm:$0xff] %v450_v32  ;;  %v442_v34 = vadd.f32 %v560_v26, %v441_v33 }
 0x1c3   : > { %454 = vst [vmem:[%s233_s10 + $0x8] sm:$0xff] %v442_v34 }
 0x1c4   : > { %718 = shalt.err (!%p715_p0)
}
 0x1c5   : > { %s719_s26 = scalar_lea.hbm %s893_s15, 512  ;;  %s723_s7 = scalar_lea.hbm %s940_s5, 1024 }
 0x1c6   : > { %p720_p1 = scmp.ne.s32.totalorder %s893_s15, %s719_s26  ;;  %p724_p4 = scmp.lt.s32.totalorder %s893_s15, %s940_s5 }
 0x1c7   : > { %p725_p7 = scmp.lt.s32.totalorder %s723_s7, %s719_s26 }
 0x1c8   : > { %p721_p2 = pnand %p720_p1, %p845_p5 }
 0x1c9   : > { %p726_p8 = por %p725_p7, %p724_p4 }
 0x1ca   : > { %p722_p3 = pneg %p721_p2 }
 0x1cc   : > { %p727_p6 = pnand %p726_p8, %p722_p3 }
 0x1ce   : > { %730 = shalt.err (!%p727_p6)
}
 0x1cf   : > { %s775_s10 = smov 128   ;;  %s776_s12 = smov 8  }
 0x1d0   : > { %618 = dma.vmem_to_hbm [thread:$0]  (%p845_p5), %s888_s11, 512, %s893_s15, %s895_s16, %s775_s10, %s775_s10, %s776_s12  }
 0x1d1 PF: > { %p630_p9 = scmp.ge.s32.totalorder %s769_s21, 2  ;;  %s486_s13 = sand.u32 1, %s757_s18  }
 0x1d2   : > { %p944_p10 = scmp.ne.s32.totalorder %s942_s29, 0  ;;  %s487_s14 = scalar_lea.sflag [#allocation4], %s486_s13 }
 0x1d4   : > { %p625_p11 = pnand %p630_p9, %p944_p10 }
 0x1d6   : > { %p626_p12 = pneg %p625_p11 }
 0x1d8   : > { %752 = dma.done.wait (%p626_p12), %s487_s14, 512  }
 0x1d9   : > { %754 = vsyncadd (%p626_p12), %s487_s14, 4294966784  ;;  %p16_p13 = scmp.ge.s32.totalorder %s832_s24, 4   ;;  %s945_s18 = smov %s761_s19 }
 0x1da   : > { %s946_s19 = smov %s765_s20  ;;  %s947_s20 = smov %s843_s27 }
 0x1db   : > { %s948_s21 = smov %s832_s24  ;;  %18 = sbr.rel (!%p16_p13) target bundleno = 4 (0x4), region = 80 }
 0x1e0   :  { %492 = vsyncpa [#allocation3], 1 }
 0x1e1   :  { %494 = vsyncpa [#allocation3 + $0x1], 1 }
 0x1e2   :  { %495 = vsyncpa [#allocation4], 1 }
 0x1e3   :  { %497 = vsyncpa [#allocation4 + $0x1], 1 }

</bundles_post_ra>
